<compile_context>
chip_gen: v6e
topology: v6e:2x2x1
jax: 0.10.0
libtpu: 0.0.40
codegen_flags: <defaults>
</compile_context>

<pallas_src>
import jax
import jax.numpy as jnp
from jax.experimental import pallas as pl
from jax.experimental.pallas import tpu as pltpu


def mlp_kernel(x_ref, w1_ref, b1_ref, w2_ref, b2_ref, w3t_ref, b3_ref, o_ref):
    xt = x_ref[...]                        # (4, TB)   batch on lanes
    w1 = w1_ref[...]                       # (100, 4)  PyTorch (out, in) layout

    # --- Layer 1: Linear(4, 100) + ReLU.  K=4 -> VPU broadcast-FMAs. ---
    h1 = w1[:, 0:1] * xt[0:1, :]           # (100,1)*(1,TB) -> (100,TB)
    for k in range(1, 4):                  # static, unrolled
        h1 = h1 + w1[:, k:k + 1] * xt[k:k + 1, :]
    h1 = jnp.maximum(h1 + b1_ref[...], 0.0)            # +(100,1) bias, ReLU

    # --- Layer 2: Linear(100, 10) + ReLU.  K=100 -> MXU. ---
    h2 = jnp.dot(w2_ref[...], h1, preferred_element_type=jnp.float32)  # (10,TB)
    h2 = jnp.maximum(h2 + b2_ref[...], 0.0)

    # --- Layer 3: Linear(10, 1).  One output row -> mul + sublane reduce. ---
    out = jnp.sum(h2 * w3t_ref[...], axis=0, keepdims=True)            # (1,TB)
    out = out + b3_ref[0, 0]                                           # SMEM scalar

    o_ref[...] = out.astype(o_ref.dtype)


def _round_up(n, m):
    return ((n + m - 1) // m) * m


def neural_network_forward(x, params, *, tile_b=512):
    """x: (B, 4) float32 (PyTorch layout).  params: PyTorch-shaped (W, b) pairs."""
    w1, b1, w2, b2, w3, b3 = params
    B = x.shape[0]

    # Batch -> lane axis; pad batch to a lane-aligned tile multiple.
    xt = x.astype(jnp.float32).T                        # (4, B)
    b_aligned = _round_up(max(B, 1), 128)
    tile = min(_round_up(tile_b, 128), b_aligned)
    b_pad = _round_up(b_aligned, tile)
    if b_pad != B:
        xt = jnp.pad(xt, ((0, 0), (0, b_pad - B)))

    # Kernel-side operand layouts (cheap wrapper-side plumbing only).
    b1c = b1.reshape(-1, 1)                             # (100, 1) lane-broadcast bias
    b2c = b2.reshape(-1, 1)                             # (10, 1)
    w3t = w3.T                                          # (10, 1)
    b3s = b3.reshape(1, 1)                              # (1, 1) -> SMEM scalar

    grid = (b_pad // tile,)

    out_t = pl.pallas_call(
        mlp_kernel,
        out_shape=jax.ShapeDtypeStruct((1, b_pad), jnp.float32),
        grid=grid,
        in_specs=[
            pl.BlockSpec((4, tile), lambda i: (0, i)),           # x^T batch stream
            pl.BlockSpec(w1.shape, lambda i: (0, 0)),            # VMEM-resident weights
            pl.BlockSpec(b1c.shape, lambda i: (0, 0)),
            pl.BlockSpec(w2.shape, lambda i: (0, 0)),
            pl.BlockSpec(b2c.shape, lambda i: (0, 0)),
            pl.BlockSpec(w3t.shape, lambda i: (0, 0)),
            pl.BlockSpec(memory_space=pltpu.MemorySpace.SMEM),   # scalar output bias
        ],
        out_specs=pl.BlockSpec((1, tile), lambda i: (0, i)),
        compiler_params=pltpu.CompilerParams(
            dimension_semantics=("parallel",),   # v7x: shard batch over both TCs
            vmem_limit_bytes=32 * 1024 * 1024,   # explicit; fits v5e/v6e/v7x
        ),
    )(xt, w1, b1c, w2, b2c, w3t, b3s)

    return out_t.T[:B]                                   # back to (B, 1)


def init_params(key):
    """PyTorch nn.Linear default init: U(-1/sqrt(fan_in), +1/sqrt(fan_in))."""
    layer_dims = [(4, 100), (100, 10), (10, 1)]
    params = []
    for fan_in, fan_out in layer_dims:
        kw, kb, key = jax.random.split(key, 3)
        bound = fan_in ** -0.5
        w = jax.random.uniform(kw, (fan_out, fan_in), jnp.float32, -bound, bound)
        b = jax.random.uniform(kb, (fan_out,), jnp.float32, -bound, bound)
        params += [w, b]
    return tuple(params)


def reference_forward(x, params):
    w1, b1, w2, b2, w3, b3 = params
    h1 = jnp.maximum(x @ w1.T + b1, 0.0)
    h2 = jnp.maximum(h1 @ w2.T + b2, 0.0)
    return h2 @ w3.T + b3


if __name__ == "__main__":
    key = jax.random.PRNGKey(0)
    kx, kp = jax.random.split(key)
    params = init_params(kp)

    # Small batch consistent with the module (pads to one 128-lane tile).
    B = 8
    x = jax.random.normal(kx, (B, 4), jnp.float32)
    out = jax.block_until_ready(neural_network_forward(x, params))
    ref = reference_forward(x, params)
    assert out.shape == (B, 1), out.shape
    assert jnp.allclose(out, ref, atol=1e-4, rtol=1e-4), "mismatch vs reference (B=8)"

    # Batch spanning several grid steps (exercises the pipelined batch grid).
    B2 = 300
    x2 = jax.random.normal(kx, (B2, 4), jnp.float32)
    out2 = jax.block_until_ready(neural_network_forward(x2, params, tile_b=128))
    ref2 = reference_forward(x2, params)
    assert out2.shape == (B2, 1), out2.shape
    assert jnp.allclose(out2, ref2, atol=1e-4, rtol=1e-4), "mismatch vs reference (B=300)"

    print("KERNEL_OK")
</pallas_src>

<mosaic_0001>
module attributes {stable_mosaic.version = 11 : i64} {
  func.func @mlp_kernel(%arg0: i32, %arg1: memref<4x128xf32, #tpu.memory_space<vmem>>, %arg2: memref<100x4xf32, #tpu.memory_space<vmem>>, %arg3: memref<100x1xf32, #tpu.memory_space<vmem>>, %arg4: memref<10x100xf32, #tpu.memory_space<vmem>>, %arg5: memref<10x1xf32, #tpu.memory_space<vmem>>, %arg6: memref<10x1xf32, #tpu.memory_space<vmem>>, %arg7: memref<1x1xf32, #tpu.memory_space<smem>>, %arg8: memref<1x128xf32, #tpu.memory_space<vmem>>) attributes {dimension_semantics = [#tpu.dimension_semantics<parallel>], iteration_bounds = array<i64: 1>, scalar_prefetch = 0 : i64, scratch_operands = 0 : i64, tpu.core_type = #tpu.core_type<tc>, window_params = [{transform_indices = @transform_0, window_bounds = array<i64: 4, 128>}, {pipeline_mode = #tpu.pipeline_mode<synchronous>, transform_indices = @transform_1, window_bounds = array<i64: 100, 4>}, {pipeline_mode = #tpu.pipeline_mode<synchronous>, transform_indices = @transform_2, window_bounds = array<i64: 100, 1>}, {pipeline_mode = #tpu.pipeline_mode<synchronous>, transform_indices = @transform_3, window_bounds = array<i64: 10, 100>}, {pipeline_mode = #tpu.pipeline_mode<synchronous>, transform_indices = @transform_4, window_bounds = array<i64: 10, 1>}, {pipeline_mode = #tpu.pipeline_mode<synchronous>, transform_indices = @transform_5, window_bounds = array<i64: 10, 1>}, {transform_indices = @transform_6, window_bounds = array<i64: 1, 1>}, {transform_indices = @transform_7, window_bounds = array<i64: 1, 128>}]} {
    %c0 = arith.constant 0 : index
    %c0_0 = arith.constant 0 : index
    %0 = vector.load %arg1[%c0, %c0_0] : memref<4x128xf32, #tpu.memory_space<vmem>>, vector<4x128xf32>
    %c0_1 = arith.constant 0 : index
    %c0_2 = arith.constant 0 : index
    %1 = vector.load %arg2[%c0_1, %c0_2] : memref<100x4xf32, #tpu.memory_space<vmem>>, vector<100x4xf32>
    %2 = vector.extract_strided_slice %1 {offsets = [0, 0], sizes = [100, 1], strides = [1, 1]} : vector<100x4xf32> to vector<100x1xf32>
    %3 = vector.extract_strided_slice %0 {offsets = [0, 0], sizes = [1, 128], strides = [1, 1]} : vector<4x128xf32> to vector<1x128xf32>
    %4 = vector.broadcast %2 : vector<100x1xf32> to vector<100x128xf32>
    %5 = vector.broadcast %3 : vector<1x128xf32> to vector<100x128xf32>
    %6 = arith.mulf %4, %5 : vector<100x128xf32>
    %7 = vector.extract_strided_slice %1 {offsets = [0, 1], sizes = [100, 1], strides = [1, 1]} : vector<100x4xf32> to vector<100x1xf32>
    %8 = vector.extract_strided_slice %0 {offsets = [1, 0], sizes = [1, 128], strides = [1, 1]} : vector<4x128xf32> to vector<1x128xf32>
    %9 = vector.broadcast %7 : vector<100x1xf32> to vector<100x128xf32>
    %10 = vector.broadcast %8 : vector<1x128xf32> to vector<100x128xf32>
    %11 = arith.mulf %9, %10 : vector<100x128xf32>
    %12 = arith.addf %6, %11 : vector<100x128xf32>
    %13 = vector.extract_strided_slice %1 {offsets = [0, 2], sizes = [100, 1], strides = [1, 1]} : vector<100x4xf32> to vector<100x1xf32>
    %14 = vector.extract_strided_slice %0 {offsets = [2, 0], sizes = [1, 128], strides = [1, 1]} : vector<4x128xf32> to vector<1x128xf32>
    %15 = vector.broadcast %13 : vector<100x1xf32> to vector<100x128xf32>
    %16 = vector.broadcast %14 : vector<1x128xf32> to vector<100x128xf32>
    %17 = arith.mulf %15, %16 : vector<100x128xf32>
    %18 = arith.addf %12, %17 : vector<100x128xf32>
    %19 = vector.extract_strided_slice %1 {offsets = [0, 3], sizes = [100, 1], strides = [1, 1]} : vector<100x4xf32> to vector<100x1xf32>
    %20 = vector.extract_strided_slice %0 {offsets = [3, 0], sizes = [1, 128], strides = [1, 1]} : vector<4x128xf32> to vector<1x128xf32>
    %21 = vector.broadcast %19 : vector<100x1xf32> to vector<100x128xf32>
    %22 = vector.broadcast %20 : vector<1x128xf32> to vector<100x128xf32>
    %23 = arith.mulf %21, %22 : vector<100x128xf32>
    %24 = arith.addf %18, %23 : vector<100x128xf32>
    %c0_3 = arith.constant 0 : index
    %c0_4 = arith.constant 0 : index
    %25 = vector.load %arg3[%c0_3, %c0_4] : memref<100x1xf32, #tpu.memory_space<vmem>>, vector<100x1xf32>
    %26 = vector.broadcast %25 : vector<100x1xf32> to vector<100x128xf32>
    %27 = arith.addf %24, %26 : vector<100x128xf32>
    %cst = arith.constant 0.000000e+00 : f32
    %28 = vector.broadcast %cst : f32 to vector<100x128xf32>
    %29 = arith.maximumf %27, %28 : vector<100x128xf32>
    %c0_5 = arith.constant 0 : index
    %c0_6 = arith.constant 0 : index
    %30 = vector.load %arg4[%c0_5, %c0_6] : memref<10x100xf32, #tpu.memory_space<vmem>>, vector<10x100xf32>
    %cst_7 = arith.constant dense<0.000000e+00> : vector<10x128xf32>
    %31 = tpu.matmul %30, %29, %cst_7 {dimension_numbers = #tpu.dot_dimension_numbers<[1], [0], [0], [1], [0, 0, 1, 1], [], []>} : vector<10x100xf32>, vector<100x128xf32>, vector<10x128xf32> -> vector<10x128xf32>
    %c0_8 = arith.constant 0 : index
    %c0_9 = arith.constant 0 : index
    %32 = vector.load %arg5[%c0_8, %c0_9] : memref<10x1xf32, #tpu.memory_space<vmem>>, vector<10x1xf32>
    %33 = vector.broadcast %32 : vector<10x1xf32> to vector<10x128xf32>
    %34 = arith.addf %31, %33 : vector<10x128xf32>
    %cst_10 = arith.constant 0.000000e+00 : f32
    %35 = vector.broadcast %cst_10 : f32 to vector<10x128xf32>
    %36 = arith.maximumf %34, %35 : vector<10x128xf32>
    %c0_11 = arith.constant 0 : index
    %c0_12 = arith.constant 0 : index
    %37 = vector.load %arg6[%c0_11, %c0_12] : memref<10x1xf32, #tpu.memory_space<vmem>>, vector<10x1xf32>
    %38 = vector.broadcast %37 : vector<10x1xf32> to vector<10x128xf32>
    %39 = arith.mulf %36, %38 : vector<10x128xf32>
    %cst_13 = arith.constant dense<0.000000e+00> : vector<128xf32>
    %40 = vector.multi_reduction <add>, %39, %cst_13 [0] : vector<10x128xf32> to vector<128xf32>
    %41 = vector.shape_cast %40 : vector<128xf32> to vector<1x128xf32>
    %c0_14 = arith.constant 0 : index
    %c0_15 = arith.constant 0 : index
    %42 = memref.load %arg7[%c0_14, %c0_15] : memref<1x1xf32, #tpu.memory_space<smem>>
    %43 = vector.broadcast %42 : f32 to vector<1x128xf32>
    %44 = arith.addf %41, %43 : vector<1x128xf32>
    %c0_16 = arith.constant 0 : index
    %c0_17 = arith.constant 0 : index
    %45 = vector.load %arg8[%c0_16, %c0_17] : memref<1x128xf32, #tpu.memory_space<vmem>>, vector<1x128xf32>
    tpu.vector_store %arg8[%c0_16, %c0_17], %44 {strides = array<i32>} : memref<1x128xf32, #tpu.memory_space<vmem>>, vector<1x128xf32>,
    return
  }
  func.func @transform_0(%arg0: i32) -> (i32, i32) {
    %c0_i32 = arith.constant 0 : i32
    %c0_i32_0 = arith.constant 0 : i32
    return %c0_i32, %arg0 : i32, i32
  }
  func.func @transform_1(%arg0: i32) -> (i32, i32) {
    %c0_i32 = arith.constant 0 : i32
    %c0_i32_0 = arith.constant 0 : i32
    %c0_i32_1 = arith.constant 0 : i32
    return %c0_i32, %c0_i32_0 : i32, i32
  }
  func.func @transform_2(%arg0: i32) -> (i32, i32) {
    %c0_i32 = arith.constant 0 : i32
    %c0_i32_0 = arith.constant 0 : i32
    %c0_i32_1 = arith.constant 0 : i32
    return %c0_i32, %c0_i32_0 : i32, i32
  }
  func.func @transform_3(%arg0: i32) -> (i32, i32) {
    %c0_i32 = arith.constant 0 : i32
    %c0_i32_0 = arith.constant 0 : i32
    %c0_i32_1 = arith.constant 0 : i32
    return %c0_i32, %c0_i32_0 : i32, i32
  }
  func.func @transform_4(%arg0: i32) -> (i32, i32) {
    %c0_i32 = arith.constant 0 : i32
    %c0_i32_0 = arith.constant 0 : i32
    %c0_i32_1 = arith.constant 0 : i32
    return %c0_i32, %c0_i32_0 : i32, i32
  }
  func.func @transform_5(%arg0: i32) -> (i32, i32) {
    %c0_i32 = arith.constant 0 : i32
    %c0_i32_0 = arith.constant 0 : i32
    %c0_i32_1 = arith.constant 0 : i32
    return %c0_i32, %c0_i32_0 : i32, i32
  }
  func.func @transform_6(%arg0: i32) -> (i32, i32) {
    %c0_i32 = arith.constant 0 : i32
    %c0_i32_0 = arith.constant 0 : i32
    %c0_i32_1 = arith.constant 0 : i32
    return %c0_i32, %c0_i32_0 : i32, i32
  }
  func.func @transform_7(%arg0: i32) -> (i32, i32) {
    %c0_i32 = arith.constant 0 : i32
    %c0_i32_0 = arith.constant 0 : i32
    return %c0_i32, %arg0 : i32, i32
  }
}

</mosaic_0001>

<bundles_post_ra>
// kernel: tpu_custom_call.1
= control target key start
LH: loop header
LB: loop body
LE: loop exit
PB: predicated region body
PF: predicated region fallthrough
CT: control target
= control target key end

     0   :  { %v734_v2 = vmov 1   ;;  %v735_v3 = vmov 0   ;;  %s1088_s0 = inlined_call_operand.vmem [shape: f32[4,128], index: 0, kind: input, shape index: {}]   ;;  %s1089_s1 = inlined_call_operand.vmem [shape: f32[100,4], index: 1, kind: input, shape index: {}]   ;;  %s1090_s2 = inlined_call_operand.vmem [shape: f32[100,1], index: 2, kind: input, shape index: {}]   ;;  %s1091_s3 = inlined_call_operand.vmem [shape: f32[10,100], index: 3, kind: input, shape index: {}]   ;;  %s1092_s4 = inlined_call_operand.vmem [shape: f32[10,1], index: 4, kind: input, shape index: {}]   ;;  %s1093_s5 = inlined_call_operand.vmem [shape: f32[10,1], index: 5, kind: input, shape index: {}]   ;;  %s1094_s6 = inlined_call_operand.<no memory space> [shape: f32[1,1], index: 6, kind: input, shape index: {}]   ;;  %s1095_s7 = inlined_call_operand.hbm [shape: f32[1,128], index: 7, kind: output, shape index: {}]  }
   0x1   :  { %v782_v0 = vld [vmem:[%s1089_s1 + $0x60] sm:$0xf]  ;;  %v40_v1 = vld [vmem:[%s1089_s1 + $0x58] sm:$0xff]  ;;  %669 = vset.pattern.permute.xlu0 %v734_v2  ;;  %670 = vset.pattern.permute.xlu1 %v735_v3 }
   0x2   :  { %173 = vperm.xlu0 %669, %v782_v0   ;;  %99 = vperm.xlu1 %670, %v40_v1   ;;  %v37_v4 = vld [vmem:[%s1089_s1 + $0x40] sm:$0xff] }
   0x6   :  { %671 = vset.pattern.permute.xlu1 %v734_v2  ;;  %157 = vperm.xlu0 %669, %v37_v4  }
   0x7   :  { %13 = vsyncpa [#allocation4], 0  ;;  %169 = vperm.xlu1 %671, %v40_v1   ;;  %v797_v5 = vld [vmem:[%s1089_s1 + $0x28] sm:$0xff]  ;;  %v736_v6 = vmov 2   ;;  %v804_v7 = vld [vmem:[%s1089_s1 + $0x10] sm:$0xff]  ;;  %v737_v10 = vmov 3   ;;  %v107_v40 = vlaneseq }
   0x8   :  { %v39_v8 = vld [vmem:[%s1089_s1 + $0x50] sm:$0xff]  ;;  %v38_v9 = vld [vmem:[%s1089_s1 + $0x48] sm:$0xff]  ;;  %v382_v11 = vld [vmem:[%s1090_s2 + $0x60] sm:$0xf]  ;;  %vm495_vm0 = vcmask 1043456   ;;  %vm488_vm1 = vcmask 818176  }
   0x9   :  { %v35_v12 = vld [vmem:[%s1089_s1 + $0x30] sm:$0xff]  ;;  %v379_v13 = vld [vmem:[%s1090_s2 + $0x48] sm:$0xff]  ;;  %v839_v14 = vld [vmem:[%s1089_s1 + $0x18] sm:$0xff]  ;;  %v108_v43 = vshrl.u32 %v107_v40, 7  ;;  %vm590_vm2 = vcmask 1041408   ;;  %s738_s17 = smov [#allocation3]  }
   0xa   :  { %145 = vperm.xlu0 %669, %v797_v5   ;;  %v36_v15 = vld [vmem:[%s1089_s1 + $0x38] sm:$0xff]  ;;  %v376_v16 = vld [vmem:[%s1090_s2 + $0x30] sm:$0xff]  ;;  %v853_v17 = vld [vmem:[%s1089_s1] sm:$0xff]  ;;  %s609_s18 = sshll.u32 %s738_s17, 4  ;;  %s610_s18 = int_to_ptr.vmem [resolvable:$true] %s609_s18 }
   0xb   :  { %672 = vset.pattern.permute.xlu1 %v736_v6  ;;  %v381_v18 = vld [vmem:[%s1090_s2 + $0x58] sm:$0xff]  ;;  %v380_v19 = vld [vmem:[%s1090_s2 + $0x50] sm:$0xff]  ;;  %v873_v20 = vld [vmem:[%s1089_s1 + $0x8] sm:$0xff]  ;;  %v178_v44 = vsub.s32 1, %v108_v43  ;;  %v109_v46 = vsub.s32 0, %v108_v43  ;;  %v260_v47 = vsub.s32 2, %v108_v43  ;;  %p717_p1 = scmp.lt.s32.totalorder %s610_s18, %s610_s18 }
   0xc   :  { %255 = vperm.xlu1 %672, %v782_v0   ;;  %v371_v21 = vld [vmem:[%s1090_s2 + $0x8] sm:$0xff]  ;;  %v476_v22 = vld [vmem:[%s1092_s4] sm:$0xff]  ;;  %v377_v31 = vld [vmem:[%s1090_s2 + $0x38] sm:$0xff]  ;;  %s712_s19 = scalar_lea.vmem %s610_s18, 16  ;;  %s716_s20 = scalar_lea.vmem %s610_s18, 32 }
   0xd   :  { %v576_v23 = vld [vmem:[%s1093_s5] sm:$0xff]  ;;  %v375_v59 = vld [vmem:[%s1090_s2 + $0x28] sm:$0xff]  ;;  %p713_p0 = scmp.ne.s32.totalorder %s610_s18, %s712_s19  ;;  %p718_p2 = scmp.lt.s32.totalorder %s716_s20, %s712_s19 }
   0xe   :  { %133 = vperm.xlu0 %669, %v804_v7   ;;  %v33_v24 = vld [vmem:[%s1089_s1 + $0x20] sm:$0xff] }
   0xf   :  { %v378_v25 = vld [vmem:[%s1090_s2 + $0x40] sm:$0xff]  ;;  %p719_p3 = por %p718_p2, %p717_p1 }
  0x10   :  { %673 = vset.pattern.permute.xlu1 %v734_v2  ;;  %v28_v49 = vld [vmem:[%s1088_s0] sm:$0xf] }
  0x11   :  { %165 = vperm.xlu1 %673, %v39_v8   ;;  %v943_v50 = vrot.slane %v28_v49, %v178_v44  ;;  %v945_v52 = vrot.slane %v28_v49, %v109_v46  ;;  %v948_v54 = vrot.slane %v28_v49, %v260_v47  ;;  %p720_p4 = pnand %p719_p3, %p713_p0 }
  0x12   :  { %697 = vset.pattern.permute.xlu0 %v736_v6 }
  0x13   :  { %247 = vperm.xlu0 %697, %v39_v8  }
  0x15   :  { %674 = vset.pattern.permute.xlu1 %v736_v6 }
  0x16   :  { %251 = vperm.xlu1 %674, %v40_v1  }
  0x17   :  { %239 = vperm.xlu0 %697, %v37_v4  }
  0x1a   :  { %675 = vset.pattern.permute.xlu1 %v735_v3 }
  0x1b   :  { %89 = vperm.xlu1 %675, %v38_v9   ;;  %227 = vperm.xlu0 %697, %v797_v5  }
  0x1f   :  { %676 = vset.pattern.permute.xlu1 %v734_v2  ;;  %215 = vperm.xlu0 %697, %v804_v7  }
  0x20   :  { %161 = vperm.xlu1 %676, %v38_v9  }
  0x23   :  { %702 = vset.pattern.permute.xlu0 %v735_v3 }
  0x24   :  { %677 = vset.pattern.permute.xlu1 %v737_v10  ;;  %104 = vperm.xlu0 %702, %v782_v0  }
  0x25   :  { %333 = vperm.xlu1 %677, %v40_v1  }
  0x28   :  { %94 = vperm.xlu0 %702, %v39_v8  }
  0x29   :  { %678 = vset.pattern.permute.xlu1 %v735_v3 }
  0x2a   :  { %84 = vperm.xlu1 %678, %v37_v4  }
  0x2c   :  { %445 = vperm.xlu0 %702, %v382_v11  }
  0x2e   :  { %679 = vset.pattern.permute.xlu1 %v736_v6 }
  0x2f   :  { %243 = vperm.xlu1 %679, %v38_v9  }
  0x30   :  { %74 = vperm.xlu0 %702, %v35_v12  }
  0x33   :  { %680 = vset.pattern.permute.xlu1 %v737_v10 }
  0x34   :  { %329 = vperm.xlu1 %680, %v39_v8   ;;  %430 = vperm.xlu0 %702, %v379_v13   ;;  %v342_v8 = vsub.s32 3, %v108_v43 }
  0x36   :  { %v987_v13 = vrot.slane %v28_v49, %v342_v8 }
  0x38   :  { %681 = vset.pattern.permute.xlu1 %v735_v3  ;;  %59 = vperm.xlu0 %702, %v839_v14  }
  0x39   :  { %79 = vperm.xlu1 %681, %v36_v15  }
  0x3c   :  { %415 = vperm.xlu0 %702, %v376_v16  }
  0x3d   :  { %682 = vset.pattern.permute.xlu1 %v734_v2 }
  0x3e   :  { %153 = vperm.xlu1 %682, %v36_v15  }
  0x40   :  { %44 = vperm.xlu0 %702, %v853_v17  }
  0x42   :  { %683 = vset.pattern.permute.xlu1 %v737_v10 }
  0x43   :  { %325 = vperm.xlu1 %683, %v38_v9  }
  0x44   :  { %705 = vset.pattern.permute.xlu0 %v737_v10 }
  0x45   :  { %337 = vperm.xlu0 %705, %v782_v0  }
  0x47   :  { %684 = vset.pattern.permute.xlu1 %v735_v3 }
  0x48   :  { %440 = vperm.xlu1 %684, %v381_v18  }
  0x49   :  { %321 = vperm.xlu0 %705, %v37_v4  }
  0x4c   :  { %685 = vset.pattern.permute.xlu1 %v734_v2 }
  0x4d   :  { %149 = vperm.xlu1 %685, %v35_v12   ;;  %309 = vperm.xlu0 %705, %v797_v5  }
  0x51   :  { %686 = vset.pattern.permute.xlu1 %v736_v6  ;;  %297 = vperm.xlu0 %705, %v804_v7  }
  0x52   :  { %235 = vperm.xlu1 %686, %v36_v15  }
  0x55   :  { %293 = vperm.xlu0 %705, %v873_v20  }
  0x56   :  { %687 = vset.pattern.permute.xlu1 %v735_v3 }
  0x57   :  { %435 = vperm.xlu1 %687, %v380_v19  }
  0x59   :  { %289 = vperm.xlu0 %705, %v853_v17  }
  0x5b   :  { %69 = vperm.xlu1 %687, %v797_v5  }
  0x5d   :  { %711 = vset.pattern.permute.xlu0 %v735_v3 }
  0x5e   :  { %390 = vperm.xlu0 %711, %v371_v21  }
  0x5f   :  { %688 = vset.pattern.permute.xlu1 %v736_v6 }
  0x60   :  { %231 = vperm.xlu1 %688, %v35_v12  }
  0x62   :  { %480 = vperm.xlu0 %711, %v476_v22  }
  0x64   :  { %689 = vset.pattern.permute.xlu1 %v737_v10 }
  0x65   :  { %317 = vperm.xlu1 %689, %v36_v15  }
  0x66   :  { %580 = vperm.xlu0 %711, %v576_v23  }
  0x69   :  { %690 = vset.pattern.permute.xlu1 %v735_v3 }
  0x6a   :  { %64 = vperm.xlu1 %690, %v33_v24  }
  0x6e   :  { %691 = vset.pattern.permute.xlu1 %v734_v2 }
  0x6f   :  { %141 = vperm.xlu1 %691, %v33_v24  }
  0x73   :  { %692 = vset.pattern.permute.xlu1 %v737_v10 }
  0x74   :  { %313 = vperm.xlu1 %692, %v35_v12  }
  0x78   :  { %693 = vset.pattern.permute.xlu1 %v735_v3 }
  0x79   :  { %425 = vperm.xlu1 %693, %v378_v25  }
  0x7d   :  { %v901_v26 = vpop.permute.xlu1 %99  ;;  %694 = vset.pattern.permute.xlu1 %v734_v2  ;;  %v904_v27 = vpop.permute.xlu0 %173 }
  0x7e   :  { %137 = vperm.xlu1 %694, %v839_v14   ;;  %v192_v9 = vmul.f32 %v943_v50, %v904_v27  ;;  %v122_v15 = vmul.f32 %v945_v52, %v901_v26 }
  0x81   :  { %v158_v28 = vpop.permute.xlu0 %157 }
  0x82   :  { %v907_v29 = vpop.permute.xlu1 %169  ;;  %695 = vset.pattern.permute.xlu1 %v736_v6  ;;  %v188_v53 = vmul.f32 %v943_v50, %v158_v28 }
  0x83   :  { %223 = vperm.xlu1 %695, %v33_v24   ;;  %v191_v12 = vmul.f32 %v943_v50, %v907_v29  ;;  %v372_v29 = vld [vmem:[%s1090_s2 + $0x10] sm:$0xff] }
  0x85   :  { %v910_v30 = vpop.permute.xlu0 %145 }
  0x86   :  { %v185_v8 = vmul.f32 %v943_v50, %v910_v30 }
  0x87   :  { %v915_v32 = vpop.permute.xlu1 %255  ;;  %696 = vset.pattern.permute.xlu1 %v735_v3 }
  0x88   :  { %420 = vperm.xlu1 %696, %v377_v31   ;;  %v274_v21 = vmul.f32 %v948_v54, %v915_v32 }
  0x89   :  { %v918_v33 = vpop.permute.xlu0 %133 }
  0x8c   :  { %v920_v34 = vpop.permute.xlu1 %165  ;;  %54 = vperm.xlu1 %696, %v804_v7   ;;  %v374_v7 = vld [vmem:[%s1090_s2 + $0x20] sm:$0xff] }
  0x8d   :  { %v190_v44 = vmul.f32 %v943_v50, %v920_v34  ;;  %v474_v34 = vld [vmem:[%s1091_s3] sm:$0xff] }
  0x8e   :  { %v923_v35 = vpop.permute.xlu0 %247  ;;  %661 = vmatprep.mubr.msk.f32.mxu0 %vm488_vm1, %v474_v34 }
  0x90   :  { %698 = vset.pattern.permute.xlu1 %v736_v6 }
  0x91   :  { %v252_v36 = vpop.permute.xlu1 %251  ;;  %219 = vperm.xlu1 %698, %v839_v14  }
  0x92   :  { %v240_v37 = vpop.permute.xlu0 %239  ;;  %v273_v16 = vmul.f32 %v948_v54, %v252_v36 }
  0x93   :  { %v270_v56 = vmul.f32 %v948_v54, %v240_v37 }
  0x95   :  { %699 = vset.pattern.permute.xlu1 %v737_v10 }
  0x96   :  { %v928_v38 = vpop.permute.xlu1 %89  ;;  %305 = vperm.xlu1 %699, %v33_v24   ;;  %v930_v39 = vpop.permute.xlu0 %227  ;;  %v373_v24 = vld [vmem:[%s1090_s2 + $0x18] sm:$0xff] }
  0x9a   :  { %700 = vset.pattern.permute.xlu1 %v735_v3  ;;  %v933_v41 = vpop.permute.xlu0 %215 }
  0x9b   :  { %v935_v42 = vpop.permute.xlu1 %161  ;;  %49 = vperm.xlu1 %700, %v873_v20  }
  0x9c   :  { %v189_v36 = vmul.f32 %v943_v50, %v935_v42  ;;  %v272_v42 = vmul.f32 %v948_v54, %v923_v35 }
  0x9f   :  { %v105_v45 = vpop.permute.xlu0 %104  ;;  %701 = vset.pattern.permute.xlu1 %v734_v2 }
  0xa0   :  { %v334_v48 = vpop.permute.xlu1 %333  ;;  %129 = vperm.xlu1 %701, %v873_v20  }
  0xa1   :  { %v355_v22 = vmul.f32 %v987_v13, %v334_v48 }
  0xa3   :  { %v95_v51 = vpop.permute.xlu0 %94 }
  0xa4   :  { %703 = vset.pattern.permute.xlu1 %v737_v10  ;;  %v123_v10 = vmul.f32 %v945_v52, %v105_v45  ;;  %v121_v37 = vmul.f32 %v945_v52, %v95_v51  ;;  %v120_v45 = vmul.f32 %v945_v52, %v928_v38  ;;  %v477_v38 = vld [vmem:[%s1092_s4 + $0x8] sm:$0x3] }
  0xa5   :  { %v85_v55 = vpop.permute.xlu1 %84  ;;  %301 = vperm.xlu1 %703, %v839_v14  }
  0xa6   :  { %v119_v57 = vmul.f32 %v945_v52, %v85_v55  ;;  %v205_v18 = vadd.f32 %v192_v9, %v123_v10  ;;  %v202_v48 = vadd.f32 %v189_v36, %v120_v45  ;;  %v203_v49 = vadd.f32 %v190_v44, %v121_v37 }
  0xa7   :  { %v446_v58 = vpop.permute.xlu0 %445 }
  0xa8   :  { %v201_v60 = vadd.f32 %v188_v53, %v119_v57  ;;  %v287_v26 = vadd.f32 %v274_v21, %v205_v18  ;;  %v285_v57 = vadd.f32 %v272_v42, %v203_v49 }
  0xa9   :  { %704 = vset.pattern.permute.xlu1 %v735_v3 }
  0xaa   :  { %v244_v61 = vpop.permute.xlu1 %243  ;;  %410 = vperm.xlu1 %704, %v375_v59   ;;  %v958_v62 = vadd.f32 %v270_v56, %v201_v60 }
  0xab   :  { %v960_v63 = vpop.permute.xlu0 %74  ;;  %v271_v46 = vmul.f32 %v948_v54, %v244_v61 }
  0xac   :  { %v117_v30 = vmul.f32 %v945_v52, %v960_v63 }
  0xad   :  { %v284_v35 = vadd.f32 %v271_v46, %v202_v48 }
  0xae   :  { %706 = vset.pattern.permute.xlu1 %v734_v2 }
  0xaf   :  { %v963_v0 = vpop.permute.xlu1 %329  ;;  %125 = vperm.xlu1 %706, %v853_v17   ;;  %v966_v1 = vpop.permute.xlu0 %430 }
  0xb0   :  { %v354_v53 = vmul.f32 %v987_v13, %v963_v0  ;;  %v267_v0 = vmul.f32 %v948_v54, %v930_v39 }
  0xb2   :  { %v367_v59 = vadd.f32 %v354_v53, %v285_v57 }
  0xb3   :  { %707 = vset.pattern.permute.xlu1 %v736_v6  ;;  %v969_v4 = vpop.permute.xlu0 %59 }
  0xb4   :  { %v971_v5 = vpop.permute.xlu1 %79  ;;  %211 = vperm.xlu1 %707, %v873_v20   ;;  %v204_v20 = vadd.f32 %v191_v12, %v122_v15 }
  0xb5   :  { %v118_v44 = vmul.f32 %v945_v52, %v971_v5  ;;  %v264_v5 = vmul.f32 %v948_v54, %v933_v41 }
  0xb6   :  { %v286_v25 = vadd.f32 %v273_v16, %v204_v20 }
  0xb7   :  { %v977_v2 = vpop.permute.xlu0 %415 }
  0xb8   :  { %708 = vset.pattern.permute.xlu1 %v735_v3 }
  0xb9   :  { %v983_v11 = vpop.permute.xlu1 %153  ;;  %405 = vperm.xlu1 %708, %v374_v7  }
  0xbb   :  { %v989_v14 = vpop.permute.xlu0 %44 }
  0xbd   :  { %709 = vset.pattern.permute.xlu1 %v736_v6 }
  0xbe   :  { %v326_v19 = vpop.permute.xlu1 %325  ;;  %207 = vperm.xlu1 %709, %v853_v17   ;;  %v368_v17 = vadd.f32 %v355_v22, %v286_v25 }
  0xbf   :  { %v353_v51 = vmul.f32 %v987_v13, %v326_v19 }
  0xc0   :  { %v338_v23 = vpop.permute.xlu0 %337 }
  0xc1   :  { %v356_v27 = vmul.f32 %v987_v13, %v338_v23  ;;  %v366_v56 = vadd.f32 %v353_v51, %v284_v35 }
  0xc2   :  { %710 = vset.pattern.permute.xlu1 %v735_v3  ;;  %v370_v3 = vld [vmem:[%s1090_s2] sm:$0xff] }
  0xc3   :  { %v369_v6 = vadd.f32 %v356_v27, %v287_v26  ;;  %v441_v28 = vpop.permute.xlu1 %440  ;;  %400 = vperm.xlu1 %710, %v373_v24   ;;  %v457_v7 = vadd.f32 %v966_v1, %v366_v56 }
  0xc4   :  { %v459_v31 = vadd.f32 %v441_v28, %v368_v17  ;;  %v322_v24 = vpop.permute.xlu0 %321 }
  0xc5   :  { %v460_v32 = vadd.f32 %v446_v58, %v369_v6  ;;  %v577_v58 = vld [vmem:[%s1093_s5 + $0x8] sm:$0x3]  ;;  %v470_v15 = vmax.f32 %v457_v7, 0.0  ;;  %v352_v6 = vmul.f32 %v987_v13, %v322_v24 }
  0xc6   :  { %v472_v47 = vmax.f32 %v459_v31, 0.0 }
  0xc7   :  { %395 = vperm.xlu1 %710, %v372_v29   ;;  %v473_v40 = vmax.f32 %v460_v32, 0.0  ;;  %v365_v63 = vadd.f32 %v352_v6, %v958_v62 }
  0xc8   :  { %v150_v43 = vpop.permute.xlu1 %149 }
  0xc9   :  { %635 = vmatprep.subr.msk.mxu0 %vm495_vm0, %v473_v40  ;;  %v186_v21 = vmul.f32 %v943_v50, %v150_v43 }
  0xca   :  { %636 = vmatpush3.msk.msra.mxu0 %vm495_vm0, %v473_v40 }
  0xcb   :  { %385 = vperm.xlu1 %710, %v370_v3   ;;  %637 = vmatprep.subr.mxu0 %v472_v47  ;;  %v199_v27 = vadd.f32 %v186_v21, %v117_v30  ;;  %v187_v3 = vmul.f32 %v943_v50, %v983_v11  ;;  %v114_v30 = vmul.f32 %v945_v52, %v969_v4 }
  0xcc   :  { %638 = vmatpush3.msra.mxu0 %v472_v47 }
  0xcd   :  { %v236_v55 = vpop.permute.xlu1 %235  ;;  %v200_v46 = vadd.f32 %v187_v3, %v118_v44 }
  0xce   :  { %v269_v45 = vmul.f32 %v948_v54, %v236_v55 }
  0xcf   :  { %485 = vperm.xlu1 %710, %v477_v38   ;;  %v182_v38 = vmul.f32 %v943_v50, %v918_v33 }
  0xd0   :  { %v282_v42 = vadd.f32 %v269_v45, %v200_v46 }
  0xd2   :  { %v436_v60 = vpop.permute.xlu1 %435 }
  0xd3   :  { %v458_v61 = vadd.f32 %v436_v60, %v367_v59  ;;  %585 = vperm.xlu1 %710, %v577_v58   ;;  %v310_v60 = vpop.permute.xlu0 %309 }
  0xd5   :  { %v471_v9 = vmax.f32 %v458_v61, 0.0  ;;  %v349_v61 = vmul.f32 %v987_v13, %v310_v60 }
  0xd6   :  { %v70_v10 = vpop.permute.xlu1 %69 }
  0xd7   :  { %v116_v12 = vmul.f32 %v945_v52, %v70_v10  ;;  %639 = vmatprep.subr.mxu0 %v471_v9 }
  0xd8   :  { %640 = vmatpush3.msra.mxu0 %v471_v9 }
  0xd9   :  { %v198_v16 = vadd.f32 %v185_v8, %v116_v12  ;;  %641 = vmatprep.subr.mxu0 %v470_v15 }
  0xda   :  { %642 = vmatpush3.msra.mxu0 %v470_v15 }
  0xdb   :  { %v232_v18 = vpop.permute.xlu1 %231  ;;  %v280_v19 = vadd.f32 %v267_v0, %v198_v16 }
  0xdc   :  { %v268_v25 = vmul.f32 %v948_v54, %v232_v18  ;;  %v298_v18 = vpop.permute.xlu0 %297 }
  0xdd   :  { %v362_v7 = vadd.f32 %v349_v61, %v280_v19 }
  0xde   :  { %v281_v17 = vadd.f32 %v268_v25, %v199_v27 }
  0xe0   :  { %v318_v20 = vpop.permute.xlu1 %317 }
  0xe1   :  { %v351_v47 = vmul.f32 %v987_v13, %v318_v20 }
  0xe3   :  { %v364_v48 = vadd.f32 %v351_v47, %v282_v42 }
  0xe5   :  { %v65_v1 = vpop.permute.xlu1 %64 }
  0xe6   :  { %v115_v39 = vmul.f32 %v945_v52, %v65_v1 }
  0xea   :  { %v142_v22 = vpop.permute.xlu1 %141 }
  0xeb   :  { %v184_v23 = vmul.f32 %v943_v50, %v142_v22 }
  0xed   :  { %v197_v26 = vadd.f32 %v184_v23, %v115_v39  ;;  %v294_v39 = vpop.permute.xlu0 %293 }
  0xef   :  { %v314_v28 = vpop.permute.xlu1 %313 }
  0xf0   :  { %v350_v29 = vmul.f32 %v987_v13, %v314_v28 }
  0xf2   :  { %v363_v31 = vadd.f32 %v350_v29, %v281_v17 }
  0xf4   :  { %v426_v32 = vpop.permute.xlu1 %425  ;;  %v454_v36 = vadd.f32 %v977_v2, %v363_v31 }
  0xf5   :  { %v456_v37 = vadd.f32 %v426_v32, %v365_v63  ;;  %v111_v63 = vmul.f32 %v945_v52, %v989_v14  ;;  %v290_v32 = vpop.permute.xlu0 %289 }
  0xf6   :  { %v467_v35 = vmax.f32 %v454_v36, 0.0  ;;  %v346_v36 = vmul.f32 %v987_v13, %v298_v18 }
  0xf7   :  { %v469_v40 = vmax.f32 %v456_v37, 0.0  ;;  %v345_v37 = vmul.f32 %v987_v13, %v294_v39 }
  0xf9   :  { %v138_v43 = vpop.permute.xlu1 %137  ;;  %643 = vmatprep.subr.mxu0 %v469_v40  ;;  %v391_v47 = vpop.permute.xlu0 %390 }
  0xfa   :  { %644 = vmatpush3.msra.mxu0 %v469_v40  ;;  %v183_v19 = vmul.f32 %v943_v50, %v138_v43 }
  0xfe   :  { %v224_v62 = vpop.permute.xlu1 %223 }
  0xff   :  { %v266_v41 = vmul.f32 %v948_v54, %v224_v62 }
 0x101   :  { %v279_v16 = vadd.f32 %v266_v41, %v197_v26  ;;  %v196_v26 = vadd.f32 %v183_v19, %v114_v30 }
 0x103   :  { %v421_v2 = vpop.permute.xlu1 %420 }
 0x104   :  { %v455_v49 = vadd.f32 %v421_v2, %v364_v48  ;;  %v344_v2 = vmul.f32 %v987_v13, %v290_v32 }
 0x106   :  { %v468_v51 = vmax.f32 %v455_v49, 0.0 }
 0x107   :  { %v55_v34 = vpop.permute.xlu1 %54 }
 0x108   :  { %v113_v11 = vmul.f32 %v945_v52, %v55_v34  ;;  %645 = vmatprep.subr.mxu0 %v468_v51 }
 0x109   :  { %646 = vmatpush3.msra.mxu0 %v468_v51 }
 0x10a   :  { %v195_v53 = vadd.f32 %v182_v38, %v113_v11  ;;  %647 = vmatprep.subr.mxu0 %v467_v35 }
 0x10b   :  { %648 = vmatpush3.msra.mxu0 %v467_v35  ;;  %v475_v35 = vld [vmem:[%s1091_s3 + $0x8] sm:$0x3] }
 0x10c   :  { %v220_v55 = vpop.permute.xlu1 %219  ;;  %v277_v56 = vadd.f32 %v264_v5, %v195_v53  ;;  %v481_v5 = vpop.permute.xlu0 %480 }
 0x10d   :  { %v265_v23 = vmul.f32 %v948_v54, %v220_v55 }
 0x10f   :  { %v278_v4 = vadd.f32 %v265_v23, %v196_v26 }
 0x111   :  { %v306_v57 = vpop.permute.xlu1 %305 }
 0x112   :  { %v348_v12 = vmul.f32 %v987_v13, %v306_v57 }
 0x114   :  { %v361_v20 = vadd.f32 %v348_v12, %v279_v16  ;;  %v600_v16 = vstv %s1094_s6 }
 0x116   :  { %v50_v58 = vpop.permute.xlu1 %49 }
 0x117   :  { %v112_v24 = vmul.f32 %v945_v52, %v50_v58 }
 0x11b   :  { %v130_v59 = vpop.permute.xlu1 %129 }
 0x11c   :  { %v181_v21 = vmul.f32 %v943_v50, %v130_v59 }
 0x11e   :  { %v194_v6 = vadd.f32 %v181_v21, %v112_v24 }
 0x120   :  { %v302_v33 = vpop.permute.xlu1 %301 }
 0x121   :  { %v347_v28 = vmul.f32 %v987_v13, %v302_v33  ;;  %v581_v33 = vpop.permute.xlu0 %580 }
 0x123   :  { %v360_v43 = vadd.f32 %v347_v28, %v278_v4 }
 0x125   :  { %v411_v8 = vpop.permute.xlu1 %410 }
 0x126   :  { %v453_v9 = vadd.f32 %v411_v8, %v362_v7 }
 0x128   :  { %v466_v10 = vmax.f32 %v453_v9, 0.0 }
 0x12a   :  { %v126_v0 = vpop.permute.xlu1 %125  ;;  %649 = vmatprep.subr.mxu0 %v466_v10 }
 0x12b   :  { %650 = vmatpush3.msra.mxu0 %v466_v10  ;;  %v180_v29 = vmul.f32 %v943_v50, %v126_v0  ;;  %v359_v50 = vadd.f32 %v346_v36, %v277_v56 }
 0x12d   :  { %v193_v44 = vadd.f32 %v180_v29, %v111_v63 }
 0x12f   :  { %v212_v15 = vpop.permute.xlu1 %211 }
 0x130   :  { %v263_v25 = vmul.f32 %v948_v54, %v212_v15 }
 0x132   :  { %v276_v31 = vadd.f32 %v263_v25, %v194_v6 }
 0x134   :  { %v406_v1 = vpop.permute.xlu1 %405  ;;  %v358_v45 = vadd.f32 %v345_v37, %v276_v31 }
 0x135   :  { %v452_v22 = vadd.f32 %v406_v1, %v361_v20 }
 0x136   :  { %v449_v52 = vadd.f32 %v391_v47, %v358_v45 }
 0x137   :  { %v465_v27 = vmax.f32 %v452_v22, 0.0 }
 0x139   :  { %v208_v17 = vpop.permute.xlu1 %207  ;;  %651 = vmatprep.subr.mxu0 %v465_v27 }
 0x13a   :  { %652 = vmatpush3.msra.mxu0 %v465_v27  ;;  %v262_v40 = vmul.f32 %v948_v54, %v208_v17  ;;  %v462_v54 = vmax.f32 %v449_v52, 0.0 }
 0x13c   :  { %v275_v62 = vadd.f32 %v262_v40, %v193_v44 }
 0x13e   :  { %v401_v3 = vpop.permute.xlu1 %400  ;;  %v357_v51 = vadd.f32 %v344_v2, %v275_v62 }
 0x13f   :  { %v451_v46 = vadd.f32 %v401_v3, %v360_v43 }
 0x141   :  { %v464_v42 = vmax.f32 %v451_v46, 0.0 }
 0x142   :  { %v396_v48 = vpop.permute.xlu1 %395 }
 0x143   :  { %v450_v14 = vadd.f32 %v396_v48, %v359_v50  ;;  %653 = vmatprep.subr.mxu0 %v464_v42 }
 0x144   :  { %654 = vmatpush3.msra.mxu0 %v464_v42 }
 0x145   :  { %v463_v49 = vmax.f32 %v450_v14, 0.0 }
 0x146   :  { %v386_v34 = vpop.permute.xlu1 %385 }
 0x147   :  { %v448_v38 = vadd.f32 %v386_v34, %v357_v51  ;;  %655 = vmatprep.subr.mxu0 %v463_v49 }
 0x148   :  { %656 = vmatpush3.msra.mxu0 %v463_v49 }
 0x149   :  { %v461_v11 = vmax.f32 %v448_v38, 0.0  ;;  %657 = vmatprep.subr.mxu0 %v462_v54 }
 0x14a   :  { %658 = vmatpush3.msra.mxu0 %v462_v54  ;;  %v486_v13 = vpop.permute.xlu1 %485 }
 0x14b   :  { %659 = vmatprep.subr.mxu0 %v461_v11 }
 0x14c   :  { %660 = vmatpush3.msra.mxu0 %v461_v11 }
 0x14d   :  { %662 = vmatmul.mubr.msk.f32.vlgmr.msra.gmra.mxu0 %vm488_vm1, %v475_v35 }
 0x14e   :  { %v586_v59 = vpop.permute.xlu1 %585 }
 0x20d   :  { %v663_v53 = vpop.f32.mrf.mxu0 }
 0x20e   :  { %v571_v55 = vadd.f32 %v663_v53, %v486_v13 }
 0x20f   :  { %v565_v56 = vpop.f32.mrf.mxu0 }
 0x210   :  { %v575_v57 = vmax.f32 %v571_v55, 0.0  ;;  %v566_v58 = vadd.f32 %v565_v56, %v481_v5 }
 0x212   :  { %v589_v60 = vmul.f32 %v586_v59, %v575_v57  ;;  %v574_v61 = vmax.f32 %v566_v58, 0.0 }
 0x214   :  { %v591_v7 = vsel %vm590_vm2, %v589_v60, 0.0  ;;  %v588_v8 = vmul.f32 %v581_v33, %v574_v61 }
 0x216   :  { %v592_v9 = vadd.f32 %v591_v7, %v588_v8 }
 0x218   :  { %v593_v10 = vrot.slane %v592_v9, 4 }
 0x21a   :  { %v594_v0 = vadd.f32 %v593_v10, %v592_v9 }
 0x21c   :  { %v595_v41 = vrot.slane %v594_v0, 2 }
 0x21e   :  { %v596_v12 = vadd.f32 %v595_v41, %v594_v0 }
 0x220   :  { %v597_v15 = vrot.slane %v596_v12, 1 }
 0x222   :  { %v598_v18 = vadd.f32 %v597_v15, %v596_v12 }
 0x224   :  { %v601_v20 = vadd.f32 %v600_v16, %v598_v18 }
 0x226   :  { %602 = vst [vmem:[#allocation3] sm:$0x1] %v601_v20 }
 0x227   :  { %723 = shalt.err (!%p720_p4)
}
 0x228   :  { %612 = dma.vmem_to_hbm [thread:$0]  %s610_s18, 16, %s1095_s7, [#allocation4]  }
 0x229   :  { %732 = dma.done.wait [#allocation4], 16  }
 0x22a   :  { %733 = vsyncadd [#allocation4], 4294967280 }
 0x22b   :  { %616 = vsyncpa [#allocation4], 1 }

</bundles_post_ra>
